<compile_context>
chip_gen: v5e
topology: v5e:2x2
jax: 0.10.0
libtpu: 0.0.40
codegen_flags: <defaults>
</compile_context>

<pallas_src>
import jax
import jax.numpy as jnp
from jax.experimental import pallas as pl
from jax.experimental.pallas import tpu as pltpu


def _round_up(x, m):
    return ((x + m - 1) // m) * m


def _conv1x1_tanh_kernel(w_ref, b_ref, x_ref, o_ref):
    # w_ref: (C_out, C_in)  resident LHS (constant index_map -> no re-DMA)
    # b_ref: (C_out, 1)     resident bias, lane-broadcast in the add
    # x_ref: (C_in, ts)     one spatial tile of one batch element
    # o_ref: (C_out, ts)    lane-dense output tile
    acc = jnp.dot(w_ref[...], x_ref[...], preferred_element_type=jnp.float32)
    acc = acc + b_ref[...]
    o_ref[...] = jnp.tanh(acc).astype(o_ref.dtype)


def fusion_forward(x_nchw, weight, bias, *, ts=512):
    """Conv2d(C_in -> C_out, kernel_size=1) + Tanh on NCHW input.

    x_nchw: (N, C_in, H, W); weight: (C_out, C_in); bias: (C_out,).
    Returns (N, C_out, H, W) in the input dtype.
    """
    N, C_in, H, W = x_nchw.shape
    C_out = weight.shape[0]
    S = H * W

    # NCHW -> (N, C_in, H*W): contiguous reshape, no data movement.
    x_flat = x_nchw.reshape(N, C_in, S)

    # Lane-dense spatial tile: multiple of 128, capped so tiny inputs run in a
    # single grid step per batch element.  Ragged last tile handled by padding.
    ts = min(ts, _round_up(S, 128))
    S_pad = _round_up(S, ts)
    if S_pad != S:
        x_flat = jnp.pad(x_flat, ((0, 0), (0, 0), (0, S_pad - S)))

    b2 = bias.reshape(C_out, 1)

    out_flat = pl.pallas_call(
        _conv1x1_tanh_kernel,
        out_shape=jax.ShapeDtypeStruct((N, C_out, S_pad), x_nchw.dtype),
        grid_spec=pltpu.PrefetchScalarGridSpec(
            num_scalar_prefetch=0,
            grid=(N, S_pad // ts),
            in_specs=[
                pl.BlockSpec((C_out, C_in), lambda n, s: (0, 0)),
                pl.BlockSpec((C_out, 1), lambda n, s: (0, 0)),
                pl.BlockSpec((None, C_in, ts), lambda n, s: (n, 0, s)),
            ],
            out_specs=pl.BlockSpec((None, C_out, ts), lambda n, s: (n, 0, s)),
        ),
        compiler_params=pltpu.CompilerParams(
            # Both axes are independent -> shards across v7x's 2 TensorCores;
            # neutral on v5e/v6e.
            dimension_semantics=("parallel", "parallel")),
    )(weight, b2, x_flat)

    if S_pad != S:
        out_flat = out_flat[:, :, :S]
    return out_flat.reshape(N, C_out, H, W)


if __name__ == "__main__":
    # Small shapes consistent with the module: feature_dim=64 -> C_in=128, C_out=64.
    feature_dim = 64
    N, H, W = 2, 16, 16
    C_in = 2 * feature_dim

    key = jax.random.PRNGKey(0)
    kx, kw, kb = jax.random.split(key, 3)

    x = jax.random.normal(kx, (N, C_in, H, W), dtype=jnp.float32)

    # Deterministic parameter init mimicking PyTorch Conv2d defaults
    # (kaiming-uniform with fan_in = C_in * 1 * 1).
    bound = 1.0 / jnp.sqrt(jnp.float32(C_in))
    weight = jax.random.uniform(kw, (feature_dim, C_in),
                                minval=-bound, maxval=bound, dtype=jnp.float32)
    bias = jax.random.uniform(kb, (feature_dim,),
                              minval=-bound, maxval=bound, dtype=jnp.float32)

    out = fusion_forward(x, weight, bias)
    jax.block_until_ready(out)

    # Pure-JAX reference: 1x1 conv == channel matmul, then bias + tanh.
    ref = jnp.tanh(
        jnp.einsum("nchw,oc->nohw", x, weight) + bias[None, :, None, None])
    assert out.shape == (N, feature_dim, H, W)
    assert jnp.allclose(out, ref, atol=1e-5, rtol=1e-5)

    print("KERNEL_OK")
</pallas_src>

<mosaic_0001>
module attributes {stable_mosaic.version = 11 : i64} {
  func.func @_conv1x1_tanh_kernel(%arg0: i32, %arg1: i32, %arg2: memref<64x128xf32, #tpu.memory_space<vmem>>, %arg3: memref<64x1xf32, #tpu.memory_space<vmem>>, %arg4: memref<1x128x256xf32, #tpu.memory_space<vmem>>, %arg5: memref<1x64x256xf32, #tpu.memory_space<vmem>>) attributes {dimension_semantics = [#tpu.dimension_semantics<parallel>, #tpu.dimension_semantics<parallel>], iteration_bounds = array<i64: 2, 1>, scalar_prefetch = 0 : i64, scratch_operands = 0 : i64, tpu.core_type = #tpu.core_type<tc>, window_params = [{pipeline_mode = #tpu.pipeline_mode<synchronous>, transform_indices = @transform_0, window_bounds = array<i64: 64, 128>}, {pipeline_mode = #tpu.pipeline_mode<synchronous>, transform_indices = @transform_1, window_bounds = array<i64: 64, 1>}, {transform_indices = @transform_2, window_bounds = array<i64: 1, 128, 256>}, {transform_indices = @transform_3, window_bounds = array<i64: 1, 64, 256>}]} {
    %c0 = arith.constant 0 : index
    %c0_0 = arith.constant 0 : index
    %0 = vector.load %arg2[%c0, %c0_0] : memref<64x128xf32, #tpu.memory_space<vmem>>, vector<64x128xf32>
    %c0_1 = arith.constant 0 : index
    %c0_2 = arith.constant 0 : index
    %c0_3 = arith.constant 0 : index
    %1 = vector.load %arg4[%c0_1, %c0_2, %c0_3] : memref<1x128x256xf32, #tpu.memory_space<vmem>>, vector<1x128x256xf32>
    %2 = vector.shape_cast %1 : vector<1x128x256xf32> to vector<128x256xf32>
    %cst = arith.constant dense<0.000000e+00> : vector<64x256xf32>
    %3 = tpu.matmul %0, %2, %cst {dimension_numbers = #tpu.dot_dimension_numbers<[1], [0], [0], [1], [0, 0, 1, 1], [], []>} : vector<64x128xf32>, vector<128x256xf32>, vector<64x256xf32> -> vector<64x256xf32>
    %c0_4 = arith.constant 0 : index
    %c0_5 = arith.constant 0 : index
    %4 = vector.load %arg3[%c0_4, %c0_5] : memref<64x1xf32, #tpu.memory_space<vmem>>, vector<64x1xf32>
    %5 = vector.broadcast %4 : vector<64x1xf32> to vector<64x256xf32>
    %6 = arith.addf %3, %5 : vector<64x256xf32>
    %7 = math.tanh %6 : vector<64x256xf32>
    %c0_6 = arith.constant 0 : index
    %c0_7 = arith.constant 0 : index
    %c0_8 = arith.constant 0 : index
    %8 = vector.load %arg5[%c0_6, %c0_7, %c0_8] : memref<1x64x256xf32, #tpu.memory_space<vmem>>, vector<1x64x256xf32>
    %9 = vector.shape_cast %8 : vector<1x64x256xf32> to vector<64x256xf32>
    %10 = vector.shape_cast %7 : vector<64x256xf32> to vector<1x64x256xf32>
    tpu.vector_store %arg5[%c0_6, %c0_7, %c0_8], %10 {strides = array<i32>} : memref<1x64x256xf32, #tpu.memory_space<vmem>>, vector<1x64x256xf32>,
    return
  }
  func.func @transform_0(%arg0: i32, %arg1: i32) -> (i32, i32) {
    %c0_i32 = arith.constant 0 : i32
    %c0_i32_0 = arith.constant 0 : i32
    %c0_i32_1 = arith.constant 0 : i32
    return %c0_i32, %c0_i32_0 : i32, i32
  }
  func.func @transform_1(%arg0: i32, %arg1: i32) -> (i32, i32) {
    %c0_i32 = arith.constant 0 : i32
    %c0_i32_0 = arith.constant 0 : i32
    %c0_i32_1 = arith.constant 0 : i32
    return %c0_i32, %c0_i32_0 : i32, i32
  }
  func.func @transform_2(%arg0: i32, %arg1: i32) -> (i32, i32, i32) {
    %c0_i32 = arith.constant 0 : i32
    %c0_i32_0 = arith.constant 0 : i32
    return %arg0, %c0_i32, %arg1 : i32, i32, i32
  }
  func.func @transform_3(%arg0: i32, %arg1: i32) -> (i32, i32, i32) {
    %c0_i32 = arith.constant 0 : i32
    %c0_i32_0 = arith.constant 0 : i32
    return %arg0, %c0_i32, %arg1 : i32, i32, i32
  }
}

</mosaic_0001>

<bundles_post_ra>
// kernel: tpu_custom_call.1
= control target key start
LH: loop header
LB: loop body
LE: loop exit
PB: predicated region body
PF: predicated region fallthrough
CT: control target
= control target key end

     0   :  { %8 = vsyncpa [#allocation3], 0  ;;  %s1030_s0 = inlined_call_operand.vmem [shape: f32[64,128], index: 0, kind: input, shape index: {}]   ;;  %s1031_s1 = inlined_call_operand.vmem [shape: f32[64,1], index: 1, kind: input, shape index: {}]   ;;  %s1032_s2 = inlined_call_operand.hbm [shape: f32[2,128,256], index: 2, kind: input, shape index: {}]   ;;  %s1033_s3 = inlined_call_operand.hbm [shape: f32[2,64,256], index: 3, kind: output, shape index: {}]  }
   0x1   :  { %10 = vsyncpa [#allocation3 + $0x1], 0 }
   0x2   :  { %11 = vsyncpa [#allocation4], 0 }
   0x3   :  { %13 = vsyncpa [#allocation4 + $0x1], 0  ;;  %s808_s12 = smov 0   ;;  %s810_s13 = smov 0  }
   0x4   :  { %s812_s14 = smov 0   ;;  %s814_s15 = smov 0  }
   0x5   :  { %s816_s16 = smov 0   ;;  %s818_s17 = smov 0  }
   0x6 LB: > { %s518_s18 = sadd.s32 4294967295, %s781_s17   ;;  %s519_s19 = sadd.s32 4294967294, %s781_s17   ;;  %s781_s17 = sphi %s818_s17, %s19_s17   ;;  %s777_s16 = sphi %s816_s16, %s1042_s16   ;;  %s773_s15 = sphi %s814_s15, %s1041_s15   ;;  %s769_s14 = sphi %s812_s14, %s1040_s14   ;;  %s765_s13 = sphi %s810_s13, %s1039_s13   ;;  %s761_s12 = sphi %s808_s12, %s1038_s12  }
   0x7   : > { %s31_s20 = sadd.s32 1, %s777_s16  ;;  %s82_s21 = sadd.s32 1, %s769_s14 }
   0x8   : > { %p33_p0 = scmp.ge.s32.totalorder %s31_s20, 2  ;;  %p89_p1 = scmp.ne.s32.totalorder %s769_s14, %s765_s13 }
   0x9   : > { %p90_p2 = scmp.eq.s32.totalorder %s781_s17, 0  ;;  %p95_p3 = scmp.ne.s32.totalorder %s765_s13, %s761_s12 }
   0xa   : > { %s1044_s20 = smov (%p33_p0, %s31_s20), 0  ;;  %p96_p5 = scmp.eq.s32.totalorder %s518_s18, 0 }
   0xb   : > { %p849_p4 = por %p90_p2, %p89_p1  ;;  %s77_s23 = ssub.s32 %s777_s16, %s1044_s20 }
   0xc   : > { %p121_p6 = scmp.eq.s32.totalorder %s518_s18, 1  ;;  %p80_p7 = scmp.eq.s32.totalorder %s77_s23, 0 }
   0xd   : > { %p855_p8 = por %p96_p5, %p95_p3  ;;  %p127_p10 = scmp.eq.s32.totalorder %s519_s19, 1 }
   0xe   : > { %p859_p9 = por %p121_p6, %p89_p1  ;;  %p521_p12 = scmp.ge.s32.totalorder %s781_s17, 2 }
   0xf   : > { %s864_s26 = scalar_select %p80_p7, %s769_s14, %s82_s21  }
  0x10   : > { %p866_p11 = por %p127_p10, %p95_p3  ;;  %p579_p13 = scmp.lt.s32.totalorder %s781_s17, 2 }
  0x11   : > { %s153_s28 = sand.u32 1, %s769_s14   ;;  %s533_s30 = sshll.u32 %s777_s16, 8 }
  0x12   : > { %s522_s29 = sshll.u32 %s153_s28, 8  ;;  %s164_s6 = scalar_lea.hbm %s1032_s2, %s533_s30 }
  0x13   : > { %s157_s7 = scalar_lea.vmem [#allocation2], %s522_s29  ;;  %s165_s9 = sshll.u32 %s164_s6, 4  ;;  %s166_s9 = int_to_ptr.hbm [resolvable:$true] %s165_s9 }
  0x14   : > { %s167_s8 = sshll.u32 %s157_s7, 4  ;;  %p572_p0 = pnand %p579_p13, %p849_p4  ;;  %s168_s8 = int_to_ptr.vmem [resolvable:$true] %s167_s8 }
  0x15   : > { %p525_p1 = scmp.ge.s32.totalorder %s781_s17, 1  ;;  %s154_s10 = scalar_lea.sflag [#allocation3], %s153_s28 }
  0x16   : > { %s783_s11 = smov 256   ;;  %s784_s18 = smov 16  }
  0x17   : > { %574 = dma.hbm_to_vmem [thread:$0]  (!%p572_p0), %s166_s9, 4096, %s168_s8, %s154_s10, %s783_s11, %s783_s11, %s784_s18  }
  0x18   : > { %p175_p2 = scmp.lt.s32.totalorder %s781_s17, 3 }
  0x1a   : > { %p176_p3 = pnand %p525_p1, %p175_p2 }
  0x1b   : > { %s882_s19 = sand.u32 (!%p176_p3), 1, %s765_s13  }
  0x1c   : > { %179 = sbr.rel (%p176_p3) target bundleno = 237 (0xed), region = 32  ;;  %s526_s21 = sshll.u32 (!%p176_p3), %s882_s19, 8 }
  0x1d   : > { %s182_s23 = scalar_lea.sflag (!%p176_p3), [#allocation3], %s882_s19  ;;  %s886_s29 = scalar_lea.vmem (!%p176_p3), [#allocation2], %s526_s21 }
  0x21   : > { %752 = dma.done.wait (%p855_p8), %s182_s23, 4096  }
  0x22   : > { %754 = vsyncadd (%p855_p8), %s182_s23, 4294963200  ;;  %v249_v0 = vld [vmem:[%s886_s29 + $0xf0] sm:$0xff]  ;;  %v250_v1 = vld [vmem:[%s886_s29 + $0xf8] sm:$0xff]  ;;  %v785_v36 = vmov 0   ;;  %s527_s22 = sshll.u32 %s882_s19, 7  ;;  %s534_s28 = sshll.u32 %s773_s15, 7 }
  0x23   : > { %v247_v2 = vld [vmem:[%s886_s29 + $0xe0] sm:$0xff]  ;;  %299 = vmatpush.msra.mxu0 %v249_v0  ;;  %535 = vmatpush.msra.mxu2 %v249_v0  ;;  %v248_v3 = vld [vmem:[%s886_s29 + $0xe8] sm:$0xff]  ;;  %v245_v4 = vld [vmem:[%s886_s29 + $0xd0] sm:$0xff]  ;;  %s973_s24 = scalar_lea.vmem [#allocation5], %s527_s22  ;;  %s427_s5 = scalar_lea.hbm %s1033_s3, %s534_s28 }
  0x24   : > { %340 = vmatpush.msra.mxu1 %v250_v1  ;;  %551 = vmatpush.msra.mxu3 %v250_v1  ;;  %v246_v5 = vld [vmem:[%s886_s29 + $0xd8] sm:$0xff]  ;;  %v243_v6 = vld [vmem:[%s886_s29 + $0xc0] sm:$0xff]  ;;  %v244_v7 = vld [vmem:[%s886_s29 + $0xc8] sm:$0xff]  ;;  %s428_s15 = sshll.u32 %s973_s24, 4  ;;  %s430_s6 = sshll.u32 %s427_s5, 4  ;;  %s429_s15 = int_to_ptr.vmem [resolvable:$true] %s428_s15  ;;  %s431_s6 = int_to_ptr.hbm [resolvable:$true] %s430_s6 }
  0x25   : > { %300 = vmatpush.msra.mxu0 %v247_v2  ;;  %536 = vmatpush.msra.mxu2 %v247_v2  ;;  %v241_v8 = vld [vmem:[%s886_s29 + $0xb0] sm:$0xff]  ;;  %v242_v9 = vld [vmem:[%s886_s29 + $0xb8] sm:$0xff]  ;;  %v239_v10 = vld [vmem:[%s886_s29 + $0xa0] sm:$0xff]  ;;  %s414_s7 = scalar_lea.sflag [#allocation4], %s882_s19  ;;  %s713_s8 = sshra.s32 %s431_s6, 4  ;;  %s714_s8 = int_to_ptr.hbm [resolvable:$true] %s713_s8 }
  0x26   : > { %341 = vmatpush.msra.mxu1 %v248_v3  ;;  %552 = vmatpush.msra.mxu3 %v248_v3  ;;  %v240_v11 = vld [vmem:[%s886_s29 + $0xa8] sm:$0xff]  ;;  %v237_v12 = vld [vmem:[%s886_s29 + $0x90] sm:$0xff]  ;;  %v238_v13 = vld [vmem:[%s886_s29 + $0x98] sm:$0xff]  ;;  %s715_s9 = scalar_lea.hbm %s714_s8, 128  ;;  %s719_s18 = scalar_lea.hbm %s1033_s3, 256 }
  0x27   : > { %301 = vmatpush.msra.mxu0 %v245_v4  ;;  %537 = vmatpush.msra.mxu2 %v245_v4  ;;  %v235_v14 = vld [vmem:[%s886_s29 + $0x80] sm:$0xff]  ;;  %v236_v15 = vld [vmem:[%s886_s29 + $0x88] sm:$0xff]  ;;  %v233_v16 = vld [vmem:[%s886_s29 + $0x70] sm:$0xff]  ;;  %p716_p4 = scmp.ne.s32.totalorder %s714_s8, %s715_s9  ;;  %p720_p7 = scmp.lt.s32.totalorder %s714_s8, %s1033_s3 }
  0x28   : > { %342 = vmatpush.msra.mxu1 %v246_v5  ;;  %553 = vmatpush.msra.mxu3 %v246_v5  ;;  %v234_v17 = vld [vmem:[%s886_s29 + $0x78] sm:$0xff]  ;;  %v231_v18 = vld [vmem:[%s886_s29 + $0x60] sm:$0xff]  ;;  %v232_v19 = vld [vmem:[%s886_s29 + $0x68] sm:$0xff]  ;;  %p721_p8 = scmp.lt.s32.totalorder %s719_s18, %s715_s9 }
  0x29   : > { %302 = vmatpush.msra.mxu0 %v243_v6  ;;  %538 = vmatpush.msra.mxu2 %v243_v6  ;;  %v229_v20 = vld [vmem:[%s886_s29 + $0x50] sm:$0xff]  ;;  %v230_v21 = vld [vmem:[%s886_s29 + $0x58] sm:$0xff]  ;;  %v227_v22 = vld [vmem:[%s886_s29 + $0x40] sm:$0xff]  ;;  %p717_p5 = pnand %p716_p4, %p859_p9 }
  0x2a   : > { %343 = vmatpush.msra.mxu1 %v244_v7  ;;  %554 = vmatpush.msra.mxu3 %v244_v7  ;;  %v228_v23 = vld [vmem:[%s886_s29 + $0x48] sm:$0xff]  ;;  %v225_v24 = vld [vmem:[%s886_s29 + $0x30] sm:$0xff]  ;;  %v226_v25 = vld [vmem:[%s886_s29 + $0x38] sm:$0xff]  ;;  %p722_p10 = por %p721_p8, %p720_p7 }
  0x2b   : > { %303 = vmatpush.msra.mxu0 %v241_v8  ;;  %539 = vmatpush.msra.mxu2 %v241_v8  ;;  %v223_v26 = vld [vmem:[%s886_s29 + $0x20] sm:$0xff]  ;;  %v224_v27 = vld [vmem:[%s886_s29 + $0x28] sm:$0xff]  ;;  %v221_v28 = vld [vmem:[%s886_s29 + $0x10] sm:$0xff]  ;;  %p718_p6 = pneg %p717_p5 }
  0x2c   : > { %344 = vmatpush.msra.mxu1 %v242_v9  ;;  %555 = vmatpush.msra.mxu3 %v242_v9  ;;  %v222_v29 = vld [vmem:[%s886_s29 + $0x18] sm:$0xff]  ;;  %v219_v30 = vld [vmem:[%s886_s29] sm:$0xff]  ;;  %v220_v31 = vld [vmem:[%s886_s29 + $0x8] sm:$0xff] }
  0x2d   : > { %304 = vmatpush.msra.mxu0 %v239_v10  ;;  %540 = vmatpush.msra.mxu2 %v239_v10  ;;  %v211_v32 = vld [vmem:[%s1030_s0] sm:$0xff]  ;;  %v253_v34 = vld [vmem:[%s1031_s1 + $0x10] sm:$0xff]  ;;  %v212_v38 = vld [vmem:[%s1030_s0 + $0x8] sm:$0xff]  ;;  %p723_p13 = pnand %p722_p10, %p718_p6 }
  0x2e   : > { %345 = vmatpush.msra.mxu1 %v240_v11  ;;  %556 = vmatpush.msra.mxu3 %v240_v11  ;;  %v215_v33 = vld [vmem:[%s1030_s0 + $0x20] sm:$0xff]  ;;  %v216_v39 = vld [vmem:[%s1030_s0 + $0x28] sm:$0xff]  ;;  %v254_v40 = vld [vmem:[%s1031_s1 + $0x18] sm:$0xff] }
  0x2f   : > { %305 = vmatpush.msra.mxu0 %v237_v12  ;;  %541 = vmatpush.msra.mxu2 %v237_v12  ;;  %v251_v35 = vld [vmem:[%s1031_s1] sm:$0xff]  ;;  %v252_v41 = vld [vmem:[%s1031_s1 + $0x8] sm:$0xff]  ;;  %v213_v43 = vld [vmem:[%s1030_s0 + $0x10] sm:$0xff] }
  0x30   : > { %346 = vmatpush.msra.mxu1 %v238_v13  ;;  %557 = vmatpush.msra.mxu3 %v238_v13  ;;  %v255_v37 = vld [vmem:[%s1031_s1 + $0x20] sm:$0xff]  ;;  %v256_v42 = vld [vmem:[%s1031_s1 + $0x28] sm:$0xff]  ;;  %v217_v44 = vld [vmem:[%s1030_s0 + $0x30] sm:$0xff] }
  0x31   : > { %306 = vmatpush.msra.mxu0 %v235_v14  ;;  %542 = vmatpush.msra.mxu2 %v235_v14  ;;  %v258_v45 = vld [vmem:[%s1031_s1 + $0x38] sm:$0xff]  ;;  %v257_v46 = vld [vmem:[%s1031_s1 + $0x30] sm:$0xff] }
  0x32   : > { %347 = vmatpush.msra.mxu1 %v236_v15  ;;  %558 = vmatpush.msra.mxu3 %v236_v15  ;;  %v214_v47 = vld [vmem:[%s1030_s0 + $0x18] sm:$0xff] }
  0x33   : > { %307 = vmatpush.msra.mxu0 %v233_v16  ;;  %543 = vmatpush.msra.mxu2 %v233_v16  ;;  %v218_v48 = vld [vmem:[%s1030_s0 + $0x38] sm:$0xff] }
  0x34   : > { %348 = vmatpush.msra.mxu1 %v234_v17  ;;  %559 = vmatpush.msra.mxu3 %v234_v17 }
  0x35   : > { %308 = vmatpush.msra.mxu0 %v231_v18  ;;  %544 = vmatpush.msra.mxu2 %v231_v18 }
  0x36   : > { %349 = vmatpush.msra.mxu1 %v232_v19  ;;  %560 = vmatpush.msra.mxu3 %v232_v19 }
  0x37   : > { %309 = vmatpush.msra.mxu0 %v229_v20  ;;  %545 = vmatpush.msra.mxu2 %v229_v20 }
  0x38   : > { %350 = vmatpush.msra.mxu1 %v230_v21  ;;  %561 = vmatpush.msra.mxu3 %v230_v21 }
  0x39   : > { %310 = vmatpush.msra.mxu0 %v227_v22  ;;  %546 = vmatpush.msra.mxu2 %v227_v22 }
  0x3a   : > { %351 = vmatpush.msra.mxu1 %v228_v23  ;;  %562 = vmatpush.msra.mxu3 %v228_v23 }
  0x3b   : > { %311 = vmatpush.msra.mxu0 %v225_v24  ;;  %547 = vmatpush.msra.mxu2 %v225_v24 }
  0x3c   : > { %352 = vmatpush.msra.mxu1 %v226_v25  ;;  %563 = vmatpush.msra.mxu3 %v226_v25 }
  0x3d   : > { %312 = vmatpush.msra.mxu0 %v223_v26  ;;  %548 = vmatpush.msra.mxu2 %v223_v26 }
  0x3e   : > { %353 = vmatpush.msra.mxu1 %v224_v27  ;;  %564 = vmatpush.msra.mxu3 %v224_v27 }
  0x3f   : > { %313 = vmatpush.msra.mxu0 %v221_v28  ;;  %549 = vmatpush.msra.mxu2 %v221_v28 }
  0x40   : > { %354 = vmatpush.msra.mxu1 %v222_v29  ;;  %565 = vmatpush.msra.mxu3 %v222_v29 }
  0x41   : > { %314 = vmatpush.msra.mxu0 %v219_v30  ;;  %550 = vmatpush.msra.mxu2 %v219_v30 }
  0x42   : > { %355 = vmatpush.msra.mxu1 %v220_v31  ;;  %566 = vmatpush.msra.mxu3 %v220_v31 }
  0x43   : > { %315 = vmatmul.f32.vlgmr.msra.gmra.mxu0 %v211_v32  ;;  %327 = vmatmul.f32.vlgmr.msra.gmra.mxu2 %v215_v33 }
  0x44   : > { %356 = vmatmul.f32.vlgmr.msra.gmra.mxu1 %v211_v32  ;;  %368 = vmatmul.f32.vlgmr.msra.gmra.mxu3 %v215_v33 }
  0x45   : > { %635 = vset.pattern.permute.xlu1 %v785_v36  ;;  %634 = vset.pattern.permute.xlu0 %v785_v36 }
  0x46   : > { %271 = vperm.xlu1 %635, %v253_v34   ;;  %261 = vperm.xlu0 %634, %v251_v35  }
  0x47   : > { %636 = vset.pattern.permute.xlu2 %v785_v36 }
  0x48   : > { %281 = vperm.xlu2 %636, %v255_v37  }
  0x4b   : > { %318 = vmatmul.f32.gmra.mxu0 %v212_v38  ;;  %330 = vmatmul.f32.gmra.mxu2 %v216_v39 }
  0x4c   : > { %359 = vmatmul.f32.gmra.mxu1 %v212_v38  ;;  %371 = vmatmul.f32.gmra.mxu3 %v216_v39 }
  0x4e   : > { %276 = vperm.xlu1 %635, %v254_v40   ;;  %266 = vperm.xlu0 %634, %v252_v41  }
  0x50   : > { %286 = vperm.xlu2 %636, %v256_v42  }
  0x53   : > { %321 = vmatmul.f32.gmra.mxu0 %v213_v43  ;;  %333 = vmatmul.f32.gmra.mxu2 %v217_v44 }
  0x54   : > { %362 = vmatmul.f32.gmra.mxu1 %v213_v43  ;;  %374 = vmatmul.f32.gmra.mxu3 %v217_v44 }
  0x56   : > { %296 = vperm.xlu1 %635, %v258_v45   ;;  %291 = vperm.xlu0 %634, %v257_v46  }
  0x5b   : > { %324 = vmatmul.f32.gmra.mxu0 %v214_v47  ;;  %336 = vmatmul.f32.gmra.mxu2 %v218_v48 }
  0x5c   : > { %365 = vmatmul.f32.gmra.mxu1 %v214_v47  ;;  %377 = vmatmul.f32.gmra.mxu3 %v218_v48 }
  0xa2   : > { %v282_v54 = vpop.permute.xlu2 %281 }
  0xaa   : > { %v287_v3 = vpop.permute.xlu2 %286 }
  0xb8   : > { %v262_v49 = vpop.permute.xlu0 %261  ;;  %v272_v1 = vpop.permute.xlu1 %271 }
  0xc0   : > { %v316_v50 = vpop.f32.mrf.mxu0  ;;  %v267_v58 = vpop.permute.xlu0 %266 }
  0xc1   : > { %v317_v51 = vadd.f32 %v316_v50, %v262_v49  ;;  %v357_v52 = vpop.f32.mrf.mxu1  ;;  %v277_v16 = vpop.permute.xlu1 %276 }
  0xc2   : > { %v358_v53 = vadd.f32 %v357_v52, %v262_v49 }
  0xc3   : > { %637 = vtanh.f32 %v317_v51 }
  0xc4   : > { %639 = vtanh.f32 %v358_v53 }
  0xc6   : > { %v328_v55 = vpop.f32.mrf.mxu2 }
  0xc7   : > { %v329_v56 = vadd.f32 %v328_v55, %v282_v54  ;;  %v369_v57 = vpop.f32.mrf.mxu3 }
  0xc8   : > { %v370_v59 = vadd.f32 %v369_v57, %v282_v54  ;;  %v319_v60 = vpop.f32.mrf.mxu0  ;;  %v292_v17 = vpop.permute.xlu0 %291 }
  0xc9   : > { %v638_v61 = vpop.eup %637  ;;  %641 = vtanh.f32 %v329_v56  ;;  %v320_v62 = vadd.f32 %v319_v60, %v267_v58  ;;  %v360_v63 = vpop.f32.mrf.mxu1 }
  0xca   : > { %v640_v0 = vpop.eup %639  ;;  %397 = vst [vmem:[%s973_s24] sm:$0xff] %v638_v61  ;;  %643 = vtanh.f32 %v370_v59  ;;  %v361_v2 = vadd.f32 %v360_v63, %v267_v58  ;;  %v297_v30 = vpop.permute.xlu1 %296 }
  0xcb   : > { %398 = vst [vmem:[%s973_s24 + $0x8] sm:$0xff] %v640_v0  ;;  %645 = vtanh.f32 %v320_v62 }
  0xcc   : > { %647 = vtanh.f32 %v361_v2 }
  0xce   : > { %v331_v4 = vpop.f32.mrf.mxu2 }
  0xcf   : > { %v642_v5 = vpop.eup %641  ;;  %v332_v6 = vadd.f32 %v331_v4, %v287_v3  ;;  %v372_v7 = vpop.f32.mrf.mxu3 }
  0xd0   : > { %v644_v8 = vpop.eup %643  ;;  %405 = vst [vmem:[%s973_s24 + $0x40] sm:$0xff] %v642_v5  ;;  %v373_v9 = vadd.f32 %v372_v7, %v287_v3  ;;  %v322_v10 = vpop.f32.mrf.mxu0 }
  0xd1   : > { %v646_v11 = vpop.eup %645  ;;  %406 = vst [vmem:[%s973_s24 + $0x48] sm:$0xff] %v644_v8  ;;  %649 = vtanh.f32 %v332_v6  ;;  %v323_v12 = vadd.f32 %v322_v10, %v272_v1  ;;  %v363_v13 = vpop.f32.mrf.mxu1 }
  0xd2   : > { %v648_v14 = vpop.eup %647  ;;  %399 = vst [vmem:[%s973_s24 + $0x10] sm:$0xff] %v646_v11  ;;  %651 = vtanh.f32 %v373_v9  ;;  %v364_v15 = vadd.f32 %v363_v13, %v272_v1 }
  0xd3   : > { %400 = vst [vmem:[%s973_s24 + $0x18] sm:$0xff] %v648_v14  ;;  %653 = vtanh.f32 %v323_v12 }
  0xd4   : > { %655 = vtanh.f32 %v364_v15 }
  0xd6   : > { %v334_v18 = vpop.f32.mrf.mxu2 }
  0xd7   : > { %v650_v19 = vpop.eup %649  ;;  %v335_v20 = vadd.f32 %v334_v18, %v292_v17  ;;  %v375_v21 = vpop.f32.mrf.mxu3 }
  0xd8   : > { %v652_v22 = vpop.eup %651  ;;  %407 = vst [vmem:[%s973_s24 + $0x50] sm:$0xff] %v650_v19  ;;  %v376_v23 = vadd.f32 %v375_v21, %v292_v17  ;;  %v325_v24 = vpop.f32.mrf.mxu0 }
  0xd9   : > { %v654_v25 = vpop.eup %653  ;;  %408 = vst [vmem:[%s973_s24 + $0x58] sm:$0xff] %v652_v22  ;;  %657 = vtanh.f32 %v335_v20  ;;  %v326_v26 = vadd.f32 %v325_v24, %v277_v16  ;;  %v366_v27 = vpop.f32.mrf.mxu1 }
  0xda   : > { %v656_v28 = vpop.eup %655  ;;  %401 = vst [vmem:[%s973_s24 + $0x20] sm:$0xff] %v654_v25  ;;  %659 = vtanh.f32 %v376_v23  ;;  %v367_v29 = vadd.f32 %v366_v27, %v277_v16 }
  0xdb   : > { %402 = vst [vmem:[%s973_s24 + $0x28] sm:$0xff] %v656_v28  ;;  %661 = vtanh.f32 %v326_v26 }
  0xdc   : > { %663 = vtanh.f32 %v367_v29 }
  0xde   : > { %v337_v31 = vpop.f32.mrf.mxu2 }
  0xdf   : > { %v658_v32 = vpop.eup %657  ;;  %v338_v33 = vadd.f32 %v337_v31, %v297_v30  ;;  %v378_v34 = vpop.f32.mrf.mxu3 }
  0xe0   : > { %v660_v35 = vpop.eup %659  ;;  %409 = vst [vmem:[%s973_s24 + $0x60] sm:$0xff] %v658_v32  ;;  %v379_v36 = vadd.f32 %v378_v34, %v297_v30 }
  0xe1   : > { %v662_v37 = vpop.eup %661  ;;  %410 = vst [vmem:[%s973_s24 + $0x68] sm:$0xff] %v660_v35  ;;  %665 = vtanh.f32 %v338_v33 }
  0xe2   : > { %v664_v38 = vpop.eup %663  ;;  %403 = vst [vmem:[%s973_s24 + $0x30] sm:$0xff] %v662_v37  ;;  %667 = vtanh.f32 %v379_v36 }
  0xe3   : > { %404 = vst [vmem:[%s973_s24 + $0x38] sm:$0xff] %v664_v38 }
  0xe7   : > { %v666_v39 = vpop.eup %665 }
  0xe8   : > { %v668_v40 = vpop.eup %667  ;;  %411 = vst [vmem:[%s973_s24 + $0x70] sm:$0xff] %v666_v39 }
  0xe9   : > { %412 = vst [vmem:[%s973_s24 + $0x78] sm:$0xff] %v668_v40 }
  0xea   : > { %726 = shalt.err (!%p723_p13)
}
  0xeb   : > { %s786_s19 = smov 256   ;;  %s787_s29 = smov 16  }
  0xec   : > { %569 = dma.vmem_to_hbm [thread:$0]  (%p859_p9), %s429_s15, 2048, %s431_s6, %s414_s7, %s786_s19, %s786_s19, %s787_s29  }
  0xed PF: > { %s445_s22 = sand.u32 1, %s761_s12   ;;  %p576_p0 = pnand %p521_p12, %p866_p11 }
  0xee   : > { %s446_s24 = scalar_lea.sflag [#allocation4], %s445_s22 }
  0xef   : > { %p577_p1 = pneg %p576_p0 }
  0xf1   : > { %756 = dma.done.wait (%p577_p1), %s446_s24, 2048  }
  0xf2   : > { %758 = vsyncadd (%p577_p1), %s446_s24, 4294965248  ;;  %s19_s17 = sadd.s32 1, %s781_s17   ;;  %s1038_s12 = smov %s765_s13 }
  0xf3   : > { %p16_p2 = scmp.ge.s32.totalorder %s19_s17, 4   ;;  %s1039_s13 = smov %s769_s14 }
  0xf4   : > { %s1040_s14 = smov %s864_s26  ;;  %s1041_s15 = smov %s777_s16 }
  0xf5   : > { %s1042_s16 = smov %s1044_s20  ;;  %18 = sbr.rel (!%p16_p2) target bundleno = 6 (0x6), region = 77 }
  0xfa   :  { %452 = vsyncpa [#allocation3], 1 }
  0xfb   :  { %454 = vsyncpa [#allocation3 + $0x1], 1 }
  0xfc   :  { %455 = vsyncpa [#allocation4], 1 }
  0xfd   :  { %457 = vsyncpa [#allocation4 + $0x1], 1 }

</bundles_post_ra>
